<compile_context>
chip_gen: v7x
topology: tpu7x:2x2x1
jax: 0.10.0
libtpu: 0.0.40
codegen_flags: <defaults>
</compile_context>

<pallas_src>
from typing import NamedTuple, Optional

import jax
import jax.numpy as jnp
from jax import lax
from jax.experimental import pallas as pl
from jax.experimental.pallas import tpu as pltpu


def _round_up(n, m):
    return -(-n // m) * m


class _Layout(NamedTuple):
    total: int          # true element count (divide by this for the mean)
    pad: int            # lane-tail pad elements (< 1 sublane tile, usually 0)
    rows: int           # rows of the (rows, 128) slab
    lanes: int          # 128
    tr: int             # rows per grid tile (multiple of the sublane packing)
    nblocks: int        # number of row-tiles covering the slab
    nsplit: int         # outer "parallel" splits (2 when >= 2 tiles)
    steps: int          # tiles per split ("arbitrary" reduction axis)
    buffers: Optional[int]      # pipeline depth override (v7x) or None
    vmem_limit: Optional[int]   # vmem_limit_bytes override (v7x) or None


def _hw_tile_bytes():
    """Per-input tile bytes, pipeline depth and VMEM limit per TPU generation."""
    tile_bytes = 2 * 1024 * 1024        # v5e/v6e: 2 MiB/input tile (8 MiB pipelined)
    buffers = None                      # default double buffering
    vmem_limit = None
    try:
        info = pltpu.get_tpu_info()
        vmem = getattr(info, "vmem_capacity_bytes", None)
        if vmem is not None and vmem <= 96 * 1024 * 1024:
            # v7x-class core (64 MiB VMEM/TC, ~3.2 TB/s HBM): bigger tiles and a
            # 3-deep pipeline amortize the fixed ~0.35us per-grid-step overhead.
            tile_bytes = 4 * 1024 * 1024
            buffers = 3
            vmem_limit = 40 * 1024 * 1024   # 2 inputs x 3 bufs x 4 MiB + slack
    except Exception:
        pass                            # unknown part: keep the safe defaults
    return tile_bytes, buffers, vmem_limit


def _make_layout(total: int, dtype) -> _Layout:
    assert total > 0
    itemsize = jnp.dtype(dtype).itemsize
    lanes = 128
    sub = max(8, 32 // itemsize)        # sublane packing: f32 8, bf16 16, 8-bit 32
    tile_bytes, buffers, vmem_limit = _hw_tile_bytes()
    base_tr = max(sub, (tile_bytes // (lanes * itemsize)) // sub * sub)

    pad = (-total) % lanes              # lane-tail pad (< 128 elements)
    rows = (total + pad) // lanes
    if rows < sub:
        # Tiny input: pad up to one sublane tile so the single block exactly
        # matches the slab (trivial copy of < 1024 elements).
        pad += (sub - rows) * lanes
        rows = sub
        tr = sub
    else:
        # Largest sublane-aligned tile that never exceeds the slab; the last
        # (partial) tile overhang is masked inside the kernel, never padded.
        tr = min(base_tr, (rows // sub) * sub)

    nblocks = pl.cdiv(rows, tr)
    nsplit = 2 if nblocks >= 2 else 1   # feed both TensorCores on v7x
    steps = pl.cdiv(nblocks, nsplit)
    return _Layout(total, pad, rows, lanes, tr, nblocks, nsplit, steps,
                   buffers, vmem_limit)


def _to_tiles(a: jax.Array, L: _Layout) -> jax.Array:
    """Lane-dense (rows, 128) view of the flattened tensor.

    Zero-copy (pure reshape) when the element count is a multiple of 128;
    only the lane-tail / tiny-input cases pad (padded zeros contribute 0 to
    the squared-error sum and we divide by the true element count).
    """
    flat = a.reshape(-1)
    if L.pad:
        flat = jnp.pad(flat, (0, L.pad))
    return flat.reshape(L.rows, L.lanes)


def _make_kernel(L: _Layout):
    tr, lanes, steps, rows = L.tr, L.lanes, L.steps, L.rows

    def kernel(x_ref, t_ref, partial_ref, acc_ref):
        i = pl.program_id(0)            # split (megacore-parallel axis)
        j = pl.program_id(1)            # tile within split (reduction axis)

        @pl.when(j == 0)
        def _init():
            acc_ref[...] = jnp.zeros_like(acc_ref)

        xv = x_ref[...]
        tv = t_ref[...]
        if xv.dtype != jnp.float32:
            xv = xv.astype(jnp.float32)
        if tv.dtype != jnp.float32:
            tv = tv.astype(jnp.float32)
        d = xv - tv
        sq = d * d                      # pure VPU hot loop

        blk = i * steps + j             # logical (unclamped) tile index
        row0 = blk * tr                 # first logical row of this tile

        def _fold_add(vals):
            # Fold the (tr, 128) tile into the fixed (8, 128) accumulator:
            # 8-row-aligned reshape + leading-axis sum = pure VALU adds
            # (no XLU, no tile-sized accumulator traffic).
            acc_ref[...] += jnp.sum(vals.reshape(tr // 8, 8, lanes), axis=0)

        @pl.when(row0 + tr <= rows)     # fast path: fully in-range tile
        def _full():
            _fold_add(sq)

        @pl.when(row0 + tr > rows)      # tail (or duplicated) tile: mask rows
        def _tail():
            r = lax.broadcasted_iota(jnp.int32, (tr, lanes), 0) + row0
            _fold_add(jnp.where(r < rows, sq, 0.0))

        @pl.when(j == pl.num_programs(1) - 1)
        def _flush():
            partial_ref[...] = acc_ref[...][None, :, :]

    return kernel


def _mse_sum(x2d: jax.Array, t2d: jax.Array, L: _Layout) -> jax.Array:
    """Sum over all (valid) elements of (x - t)^2 via the Pallas kernel."""
    nblocks, steps = L.nblocks, L.steps

    def in_map(i, j):
        # Clamp so a duplicated trailing tile never DMAs out of range; the
        # kernel fully masks its contribution to zero.
        return (jnp.minimum(i * steps + j, nblocks - 1), 0)

    in_spec = pl.BlockSpec((L.tr, L.lanes), in_map)
    if L.buffers is not None:
        try:
            in_spec = pl.BlockSpec((L.tr, L.lanes), in_map,
                                   pipeline_mode=pl.Buffered(L.buffers))
        except Exception:
            in_spec = pl.BlockSpec((L.tr, L.lanes), in_map)

    cp_kwargs = dict(dimension_semantics=("parallel", "arbitrary"))
    if L.vmem_limit is not None:
        cp_kwargs["vmem_limit_bytes"] = L.vmem_limit

    itemsize = jnp.dtype(x2d.dtype).itemsize
    cost = pl.CostEstimate(
        flops=3 * L.total,
        transcendentals=0,
        bytes_accessed=2 * L.total * itemsize + L.nsplit * 8 * L.lanes * 4)

    partials = pl.pallas_call(
        _make_kernel(L),
        out_shape=jax.ShapeDtypeStruct((L.nsplit, 8, L.lanes), jnp.float32),
        grid_spec=pltpu.PrefetchScalarGridSpec(
            num_scalar_prefetch=0,
            grid=(L.nsplit, L.steps),
            in_specs=[in_spec, in_spec],
            out_specs=pl.BlockSpec((1, 8, L.lanes), lambda i, j: (i, 0, 0)),
            scratch_shapes=[pltpu.VMEM((8, L.lanes), jnp.float32)],
        ),
        compiler_params=pltpu.CompilerParams(**cp_kwargs),
        cost_estimate=cost,
    )(x2d, t2d)
    return jnp.sum(partials)


class ContentLoss:
    """Pallas port of the PyTorch ContentLoss module.

    forward(input) returns the input unchanged (identity at the JAX level, so
    no extra HBM stream) and stores self.loss = mean((input - target)**2).
    The fixed target's lane-dense layout is prepared once in __init__, so the
    per-call path only streams the input.
    """

    def __init__(self, target: jax.Array):
        self.target = target                      # .detach() is a no-op in JAX
        self._layout = _make_layout(target.size, target.dtype)
        self._t2d = _to_tiles(target, self._layout)
        self._inv_n = jnp.float32(1.0 / target.size)
        self.loss = None

    def __call__(self, x: jax.Array) -> jax.Array:
        assert x.shape == self.target.shape, "input/target shape mismatch"
        x2d = _to_tiles(x, self._layout)
        self.loss = _mse_sum(x2d, self._t2d, self._layout) * self._inv_n
        return x

    forward = __call__


if __name__ == "__main__":
    key = jax.random.PRNGKey(0)

    def check(shape, k, rtol=1e-5, atol=1e-6):
        kx, kt = jax.random.split(k)
        x = jax.random.normal(kx, shape, dtype=jnp.float32)
        # "target" is a detached feature map in the PyTorch module; here it is
        # just a deterministic synthetic tensor of the same shape.
        t = jax.random.normal(kt, shape, dtype=jnp.float32)
        m = ContentLoss(t)
        out = m(x)
        out = jax.block_until_ready(out)
        loss = jax.block_until_ready(m.loss)
        ref = jnp.mean((x - t) ** 2)
        assert out.shape == x.shape and jnp.allclose(out, x), "pass-through mismatch"
        assert jnp.allclose(loss, ref, rtol=rtol, atol=atol), (
            f"loss mismatch for {shape}: {loss} vs {ref}")

    keys = jax.random.split(key, 4)
    # Primary small NCHW feature map (single in-range tile, zero-copy layout).
    check((2, 4, 16, 16), keys[0])
    # Element count not a multiple of 128 lanes (tiny lane-tail pad path).
    check((2, 3, 5, 7), keys[1])
    # Two tiles -> 2-way split ("parallel" axis / v7x megacore), masked tail tile.
    check((3, 48, 64, 64), keys[2])
    # Odd tile count -> one split gets a clamped, fully-masked duplicate tile.
    check((4, 72, 64, 64), keys[3])

    print("KERNEL_OK")
</pallas_src>

<mosaic_0001>
module attributes {stable_mosaic.version = 11 : i64} {
  func.func @kernel(%arg0: i32, %arg1: i32, %arg2: memref<16x128xf32, #tpu.memory_space<vmem>>, %arg3: memref<16x128xf32, #tpu.memory_space<vmem>>, %arg4: memref<1x8x128xf32, #tpu.memory_space<vmem>>, %arg5: memref<8x128xf32, #tpu.memory_space<vmem>>) attributes {dimension_semantics = [#tpu.dimension_semantics<parallel>, #tpu.dimension_semantics<arbitrary>], iteration_bounds = array<i64: 1, 1>, scalar_prefetch = 0 : i64, scratch_operands = 1 : i64, tpu.core_type = #tpu.core_type<tc>, window_params = [{transform_indices = @transform_0, window_bounds = array<i64: 16, 128>}, {transform_indices = @transform_1, window_bounds = array<i64: 16, 128>}, {transform_indices = @transform_2, window_bounds = array<i64: 1, 8, 128>}]} {
    %c0_i32 = arith.constant 0 : i32
    %0 = arith.cmpi eq, %arg1, %c0_i32 : i32
    %1 = arith.extui %0 : i1 to i32
    %c0_i32_0 = arith.constant 0 : i32
    %2 = arith.cmpi ne, %1, %c0_i32_0 : i32
    scf.if %2 {
      %cst = arith.constant 0.000000e+00 : f32
      %21 = vector.broadcast %cst : f32 to vector<8x128xf32>
      %c0_12 = arith.constant 0 : index
      %c0_13 = arith.constant 0 : index
      %22 = vector.load %arg5[%c0_12, %c0_13] : memref<8x128xf32, #tpu.memory_space<vmem>>, vector<8x128xf32>
      tpu.vector_store %arg5[%c0_12, %c0_13], %21 {strides = array<i32>} : memref<8x128xf32, #tpu.memory_space<vmem>>, vector<8x128xf32>,
    } else {
    }
    %c0 = arith.constant 0 : index
    %c0_1 = arith.constant 0 : index
    %3 = vector.load %arg2[%c0, %c0_1] : memref<16x128xf32, #tpu.memory_space<vmem>>, vector<16x128xf32>
    %c0_2 = arith.constant 0 : index
    %c0_3 = arith.constant 0 : index
    %4 = vector.load %arg3[%c0_2, %c0_3] : memref<16x128xf32, #tpu.memory_space<vmem>>, vector<16x128xf32>
    %5 = arith.subf %3, %4 : vector<16x128xf32>
    %6 = arith.mulf %5, %5 : vector<16x128xf32>
    %c1_i32 = arith.constant 1 : i32
    %7 = arith.muli %arg0, %c1_i32 : i32
    %8 = arith.addi %7, %arg1 : i32
    %c16_i32 = arith.constant 16 : i32
    %9 = arith.muli %8, %c16_i32 : i32
    %c16_i32_4 = arith.constant 16 : i32
    %10 = arith.addi %9, %c16_i32_4 : i32
    %c16_i32_5 = arith.constant 16 : i32
    %11 = arith.cmpi sle, %10, %c16_i32_5 : i32
    %12 = arith.extui %11 : i1 to i32
    %c0_i32_6 = arith.constant 0 : i32
    %13 = arith.cmpi ne, %12, %c0_i32_6 : i32
    scf.if %13 {
      %c0_12 = arith.constant 0 : index
      %c0_13 = arith.constant 0 : index
      %21 = vector.load %arg5[%c0_12, %c0_13] : memref<8x128xf32, #tpu.memory_space<vmem>>, vector<8x128xf32>
      %22 = vector.shape_cast %6 : vector<16x128xf32> to vector<2x8x128xf32>
      %cst = arith.constant dense<0.000000e+00> : vector<8x128xf32>
      %23 = vector.multi_reduction <add>, %22, %cst [0] : vector<2x8x128xf32> to vector<8x128xf32>
      %24 = arith.addf %21, %23 : vector<8x128xf32>
      %c0_14 = arith.constant 0 : index
      %c0_15 = arith.constant 0 : index
      %25 = vector.load %arg5[%c0_14, %c0_15] : memref<8x128xf32, #tpu.memory_space<vmem>>, vector<8x128xf32>
      tpu.vector_store %arg5[%c0_14, %c0_15], %24 {strides = array<i32>} : memref<8x128xf32, #tpu.memory_space<vmem>>, vector<8x128xf32>,
    } else {
    }
    %c16_i32_7 = arith.constant 16 : i32
    %14 = arith.addi %9, %c16_i32_7 : i32
    %c16_i32_8 = arith.constant 16 : i32
    %15 = arith.cmpi sgt, %14, %c16_i32_8 : i32
    %16 = arith.extui %15 : i1 to i32
    %c0_i32_9 = arith.constant 0 : i32
    %17 = arith.cmpi ne, %16, %c0_i32_9 : i32
    scf.if %17 {
      %21 = tpu.iota {dimensions = array<i32: 0>} : vector<16x128xi32>
      %22 = vector.broadcast %9 : i32 to vector<16x128xi32>
      %23 = arith.addi %21, %22 : vector<16x128xi32>
      %c16_i32_12 = arith.constant 16 : i32
      %24 = vector.broadcast %c16_i32_12 : i32 to vector<16x128xi32>
      %25 = arith.cmpi slt, %23, %24 : vector<16x128xi32>
      %cst = arith.constant 0.000000e+00 : f32
      %26 = vector.broadcast %cst : f32 to vector<16x128xf32>
      %27 = arith.select %25, %6, %26 : vector<16x128xi1>, vector<16x128xf32>
      %c0_13 = arith.constant 0 : index
      %c0_14 = arith.constant 0 : index
      %28 = vector.load %arg5[%c0_13, %c0_14] : memref<8x128xf32, #tpu.memory_space<vmem>>, vector<8x128xf32>
      %29 = vector.shape_cast %27 : vector<16x128xf32> to vector<2x8x128xf32>
      %cst_15 = arith.constant dense<0.000000e+00> : vector<8x128xf32>
      %30 = vector.multi_reduction <add>, %29, %cst_15 [0] : vector<2x8x128xf32> to vector<8x128xf32>
      %31 = arith.addf %28, %30 : vector<8x128xf32>
      %c0_16 = arith.constant 0 : index
      %c0_17 = arith.constant 0 : index
      %32 = vector.load %arg5[%c0_16, %c0_17] : memref<8x128xf32, #tpu.memory_space<vmem>>, vector<8x128xf32>
      tpu.vector_store %arg5[%c0_16, %c0_17], %31 {strides = array<i32>} : memref<8x128xf32, #tpu.memory_space<vmem>>, vector<8x128xf32>,
    } else {
    }
    %c0_i32_10 = arith.constant 0 : i32
    %18 = arith.cmpi eq, %arg1, %c0_i32_10 : i32
    %19 = arith.extui %18 : i1 to i32
    %c0_i32_11 = arith.constant 0 : i32
    %20 = arith.cmpi ne, %19, %c0_i32_11 : i32
    scf.if %20 {
      %c0_12 = arith.constant 0 : index
      %c0_13 = arith.constant 0 : index
      %21 = vector.load %arg5[%c0_12, %c0_13] : memref<8x128xf32, #tpu.memory_space<vmem>>, vector<8x128xf32>
      %22 = vector.shape_cast %21 : vector<8x128xf32> to vector<1x8x128xf32>
      %c0_14 = arith.constant 0 : index
      %c0_15 = arith.constant 0 : index
      %c0_16 = arith.constant 0 : index
      %23 = vector.load %arg4[%c0_14, %c0_15, %c0_16] : memref<1x8x128xf32, #tpu.memory_space<vmem>>, vector<1x8x128xf32>
      tpu.vector_store %arg4[%c0_14, %c0_15, %c0_16], %22 {strides = array<i32>} : memref<1x8x128xf32, #tpu.memory_space<vmem>>, vector<1x8x128xf32>,
    } else {
    }
    return
  }
  func.func @transform_0(%arg0: i32, %arg1: i32) -> (i32, i32) {
    %c1_i32 = arith.constant 1 : i32
    %0 = arith.muli %arg0, %c1_i32 : i32
    %1 = arith.addi %0, %arg1 : i32
    %c0_i32 = arith.constant 0 : i32
    %2 = arith.minsi %1, %c0_i32 : i32
    %c0_i32_0 = arith.constant 0 : i32
    %c0_i32_1 = arith.constant 0 : i32
    return %2, %c0_i32_0 : i32, i32
  }
  func.func @transform_1(%arg0: i32, %arg1: i32) -> (i32, i32) {
    %c1_i32 = arith.constant 1 : i32
    %0 = arith.muli %arg0, %c1_i32 : i32
    %1 = arith.addi %0, %arg1 : i32
    %c0_i32 = arith.constant 0 : i32
    %2 = arith.minsi %1, %c0_i32 : i32
    %c0_i32_0 = arith.constant 0 : i32
    %c0_i32_1 = arith.constant 0 : i32
    return %2, %c0_i32_0 : i32, i32
  }
  func.func @transform_2(%arg0: i32, %arg1: i32) -> (i32, i32, i32) {
    %c0_i32 = arith.constant 0 : i32
    %c0_i32_0 = arith.constant 0 : i32
    %c0_i32_1 = arith.constant 0 : i32
    return %arg0, %c0_i32, %c0_i32_0 : i32, i32, i32
  }
}

</mosaic_0001>

<bundles_post_ra>
// kernel: tpu_custom_call.1
= control target key start
LH: loop header
LB: loop body
LE: loop exit
PB: predicated region body
PF: predicated region fallthrough
CT: control target
= control target key end

     0   :  { %7 = vsyncpa [#allocation4], 0  ;;  %s260_s0 = inlined_call_operand.hbm [shape: f32[16,128], index: 0, kind: input, shape index: {}]   ;;  %s261_s1 = inlined_call_operand.hbm [shape: f32[16,128], index: 1, kind: input, shape index: {}]   ;;  %s262_s2 = inlined_call_operand.hbm [shape: f32[1,8,128], index: 2, kind: output, shape index: {}]  }
   0x1   :  { %8 = vsyncpa [#allocation7], 0 }
   0x2   :  { %9 = vsyncpa [#allocation5], 0  ;;  %s204_s9 = smov [#allocation3]   ;;  %s132_s13 = scalar_lea.hbm %s260_s0, 256 }
   0x3   :  { %s21_s10 = sshll.u32 %s204_s9, 4  ;;  %p133_p0 = scmp.ne.s32.totalorder %s260_s0, %s132_s13  ;;  %s22_s10 = int_to_ptr.vmem [resolvable:$true] %s21_s10 }
   0x4   :  { %p136_p1 = scmp.lt.u32.totalorder %s132_s13, %s260_s0 }
   0x6   :  { %p138_p2 = pnand %p136_p1, %p133_p0 }
   0x8   :  { %141 = shalt.err (!%p138_p2)
}
   0x9   :  { %s142_s18 = scalar_lea.vmem %s22_s10, 256  ;;  %p147_p4 = scmp.lt.s32.totalorder %s22_s10, %s22_s10 }
   0xa   :  { %p143_p3 = scmp.ne.s32.totalorder %s22_s10, %s142_s18  ;;  %p148_p5 = scmp.lt.s32.totalorder %s142_s18, %s142_s18 }
   0xc   :  { %p149_p6 = por %p148_p5, %p147_p4 }
   0xe   :  { %p150_p7 = pnand %p149_p6, %p143_p3 }
  0x10   :  { %153 = shalt.err (!%p150_p7)
}
  0x11   :  { %s205_s19 = smov 128   ;;  %s206_s20 = smov 8  }
  0x12   :  { %27 = dma.hbm_to_vmem [thread:$0]  %s260_s0, 256, %s22_s10, [#allocation4], %s205_s19, %s205_s19, %s206_s20  }
  0x13   :  { %s207_s23 = smov [#allocation6]   ;;  %s154_s27 = scalar_lea.hbm %s261_s1, 256 }
  0x14   :  { %s39_s24 = sshll.u32 %s207_s23, 4  ;;  %p155_p8 = scmp.ne.s32.totalorder %s261_s1, %s154_s27  ;;  %s40_s24 = int_to_ptr.vmem [resolvable:$true] %s39_s24 }
  0x15   :  { %p158_p9 = scmp.lt.u32.totalorder %s154_s27, %s261_s1 }
  0x17   :  { %p160_p10 = pnand %p158_p9, %p155_p8 }
  0x19   :  { %163 = shalt.err (!%p160_p10)
}
  0x1a   :  { %s164_s4 = scalar_lea.vmem %s40_s24, 256  ;;  %p169_p12 = scmp.lt.s32.totalorder %s40_s24, %s40_s24 }
  0x1b   :  { %p165_p11 = scmp.ne.s32.totalorder %s40_s24, %s164_s4  ;;  %p170_p13 = scmp.lt.s32.totalorder %s164_s4, %s164_s4 }
  0x1d   :  { %p171_p0 = por %p170_p13, %p169_p12 }
  0x1f   :  { %p172_p1 = pnand %p171_p0, %p165_p11 }
  0x21   :  { %175 = shalt.err (!%p172_p1)
}
  0x22   :  { %45 = dma.hbm_to_vmem [thread:$0]  %s261_s1, 256, %s40_s24, [#allocation7], %s205_s19, %s205_s19, %s206_s20  }
  0x23   :  { %198 = dma.done.wait [#allocation4], 256  }
  0x24   :  { %199 = vsyncadd [#allocation4], 4294967040 }
  0x25   :  { %200 = dma.done.wait [#allocation7], 256  }
  0x26   :  { %201 = vsyncadd [#allocation7], 4294967040  ;;  %v65_v0 = vld [vmem:[#allocation3] sm:$0xff]  ;;  %v66_v1 = vld [vmem:[#allocation3 + $0x8] sm:$0xff]  ;;  %s208_s6 = smov [#allocation8]  }
  0x27   :  { %v67_v2 = vld [vmem:[#allocation6] sm:$0xff]  ;;  %v68_v3 = vld [vmem:[#allocation6 + $0x8] sm:$0xff]  ;;  %s113_s7 = sshll.u32 %s208_s6, 4  ;;  %s114_s7 = int_to_ptr.vmem [resolvable:$true] %s113_s7 }
  0x28   :  { %v69_v4 = vsub.f32 %v65_v0, %v67_v2  ;;  %v70_v5 = vsub.f32 %v66_v1, %v68_v3  ;;  %s176_s8 = scalar_lea.vmem %s114_s7, 128  ;;  %p181_p3 = scmp.lt.s32.totalorder %s114_s7, %s114_s7 }
  0x29   :  { %p177_p2 = scmp.ne.s32.totalorder %s114_s7, %s176_s8  ;;  %p182_p4 = scmp.lt.s32.totalorder %s176_s8, %s176_s8 }
  0x2a   :  { %v71_v6 = vmul.f32 %v69_v4, %v69_v4  ;;  %v72_v7 = vmul.f32 %v70_v5, %v70_v5 }
  0x2b   :  { %p183_p5 = por %p182_p4, %p181_p3 }
  0x2c   :  { %v81_v8 = vadd.f32 %v72_v7, %v71_v6 }
  0x2d   :  { %p184_p6 = pnand %p183_p5, %p177_p2 }
  0x2e   :  { %106 = vst [vmem:[#allocation8] sm:$0xff] %v81_v8 }
  0x2f   :  { %187 = shalt.err (!%p184_p6)
}
  0x30   :  { %s188_s10 = scalar_lea.hbm %s262_s2, 128 }
  0x31   :  { %p189_p7 = scmp.ne.s32.totalorder %s262_s2, %s188_s10  ;;  %p192_p8 = scmp.lt.u32.totalorder %s188_s10, %s262_s2 }
  0x33   :  { %p194_p9 = pnand %p192_p8, %p189_p7 }
  0x35   :  { %197 = shalt.err (!%p194_p9)
}
  0x36   :  { %116 = dma.vmem_to_hbm [thread:$0]  %s114_s7, 128, %s262_s2, [#allocation5]  }
  0x37   :  { %202 = dma.done.wait [#allocation5], 128  }
  0x38   :  { %203 = vsyncadd [#allocation5], 4294967168 }
  0x39   :  { %120 = vsyncpa [#allocation4], 1 }
  0x3a   :  { %121 = vsyncpa [#allocation7], 1 }
  0x3b   :  { %122 = vsyncpa [#allocation5], 1 }

</bundles_post_ra>
